<compile_context>
chip_gen: v5e
topology: v5e:2x2
jax: 0.10.0
libtpu: 0.0.40
codegen_flags: <defaults>
</compile_context>

<pallas_src>
import math

import jax
import jax.numpy as jnp
from jax.experimental import pallas as pl
from jax.experimental.pallas import tpu as pltpu

KSIZE = 5
PAD = KSIZE // 2
LN_EPS = 1e-5    # torch.nn.LayerNorm default
H2 = 64          # fixed hidden width of the second MLP layer (matches the module)


def _layernorm_noaffine(h):
    """LayerNorm over the last axis, no affine (affine folded into next Linear).

    Two-pass centered variance: one extra cheap lane reduction, but matches the
    torch/reference numerics (no E[h^2] - mean^2 cancellation).
    """
    inv_n = 1.0 / float(h.shape[-1])
    mean = jnp.sum(h, axis=-1, keepdims=True) * inv_n
    c = h - mean
    var = jnp.sum(c * c, axis=-1, keepdims=True) * inv_n
    return c * jax.lax.rsqrt(var + LN_EPS)


def _make_kernel(use_roll):
    def kernel(x_ref, tgt_ref, w1_ref, w2_ref, vec_ref, scal_ref, *rest):
        if use_roll:
            (out_ref,) = rest
            s1_ref = s2_ref = None
        else:
            s1_ref, s2_ref, out_ref = rest

        x = x_ref[...]                      # (Bb, D) f32
        D = x.shape[1]
        H1 = w1_ref.shape[1]

        # Packed small operands: row 0 = b1[:H1], row 1 = folded b2[:64],
        # row 2 = folded w3 row[:64] (lane padded).
        vec = vec_ref[...]
        b1 = vec[0:1, :H1]                  # (1, H1)
        b2 = vec[1:2, :H2]                  # (1, 64)
        w3 = vec[2:3, :H2]                  # (1, 64)
        b3 = scal_ref[0]                    # scalar (LN2 affine + bias folded)
        lam = scal_ref[1]                   # lambda_guide

        # ---------------- std_mlp (LN affines folded into the next Linear) ----
        h = jnp.dot(x, w1_ref[...], preferred_element_type=jnp.float32) + b1
        h = jnp.maximum(h, 0.0)
        h = _layernorm_noaffine(h)

        h = jnp.dot(h, w2_ref[...], preferred_element_type=jnp.float32) + b2
        h = jnp.maximum(h, 0.0)
        h = _layernorm_noaffine(h)

        # 64 -> 1 layer as a VPU/XLU lane reduce (keeps the 1-lane-wide result
        # off the MXU / MRF pop; especially important on v5e).
        logit = jnp.sum(h * w3, axis=-1, keepdims=True) + b3        # (Bb, 1)
        sigma = jax.nn.sigmoid(logit) + 1e-10                       # torch +1e-10

        # -------- symmetric gaussian taps (offset-0 tap == exp(0) == 1) ------
        inv_s2 = 1.0 / (sigma * sigma)
        t1 = jnp.exp(-0.5 * inv_s2)          # offsets +-1
        t2 = jnp.exp(-2.0 * inv_s2)          # offsets +-2
        inv_ksum = 1.0 / (1.0 + 2.0 * (t1 + t2))
        w0 = inv_ksum
        w1c = t1 * inv_ksum
        w2c = t2 * inv_ksum

        # -------- zero-padded depthwise conv: pair_k[:, j] = x[:, j-k]+x[:, j+k]
        if use_roll:
            # Lane-aligned D: XLU lane rotations + edge masks.  Masks come from
            # rotating the lane iota with the SAME shifts, so the result does
            # not depend on the rotation direction convention (wrapped lanes
            # have |src - dst| == D - k != k).
            lane = jax.lax.broadcasted_iota(jnp.int32, (1, D), 1)

            def sym_pair(k):
                xa = pltpu.roll(x, shift=k, axis=1)
                xb = pltpu.roll(x, shift=D - k, axis=1)
                sa = pltpu.roll(lane, shift=k, axis=1)
                sb = pltpu.roll(lane, shift=D - k, axis=1)
                ma = (jnp.abs(sa - lane) == k).astype(x.dtype)
                mb = (jnp.abs(sb - lane) == k).astype(x.dtype)
                return xa * ma + xb * mb

            pair1 = sym_pair(1)
            pair2 = sym_pair(2)
        else:
            # Non-lane-aligned D: banded 0/1 shift matrices precomputed on the
            # host (loop-invariant, resident); the otherwise-idle MXU absorbs
            # the two small matmuls.
            pair1 = jnp.dot(x, s1_ref[...], preferred_element_type=jnp.float32)
            pair2 = jnp.dot(x, s2_ref[...], preferred_element_type=jnp.float32)

        y = w0 * x + w1c * pair1 + w2c * pair2

        # ---------------- guided blend (fully overwrites the block) ----------
        tgt = tgt_ref[...]
        out_ref[...] = tgt + lam * (y - tgt)

    return kernel


def init_params(style_dim, key):
    """Torch-like (unfolded) parameters of Att_variance_smoothing."""
    D = style_dim
    H1 = D // 2
    k1, k2, k3 = jax.random.split(key, 3)

    def linear(k, fan_in, fan_out):
        bound = 1.0 / math.sqrt(fan_in)
        kw, kb = jax.random.split(k)
        w = jax.random.uniform(kw, (fan_in, fan_out), jnp.float32, -bound, bound)
        b = jax.random.uniform(kb, (1, fan_out), jnp.float32, -bound, bound)
        return w, b

    w1, b1 = linear(k1, D, H1)
    w2, b2 = linear(k2, H1, H2)
    w3, b3 = linear(k3, H2, 1)
    return dict(
        w1=w1, b1=b1, g1=jnp.ones((1, H1), jnp.float32), be1=jnp.zeros((1, H1), jnp.float32),
        w2=w2, b2=b2, g2=jnp.ones((1, H2), jnp.float32), be2=jnp.zeros((1, H2), jnp.float32),
        w3=w3, b3=b3,
        lam=jnp.full((1, 1), 5.0, jnp.float32),   # nn.Parameter(torch.tensor(5.0))
    )


def fold_params(p):
    """Fold LN affines into the following Linear, pack the small operands and
    (for non-lane-aligned D) precompute the banded conv shift matrices.

    Done once at init time so the per-call wrapper only issues the pallas_call.
    """
    D, H1 = p["w1"].shape
    lanes = max(128, -(-max(H1, H2) // 128) * 128)

    w2f = p["g1"].reshape(H1, 1) * p["w2"]                 # diag(g1) @ w2
    b2f = p["be1"] @ p["w2"] + p["b2"]                     # (1, 64)
    w3f = p["g2"] * p["w3"].reshape(1, H2)                 # diag(g2) @ w3, as a row
    b3f = (p["be2"] @ p["w3"])[0, 0] + p["b3"][0, 0]       # scalar

    vec = jnp.zeros((3, lanes), jnp.float32)
    vec = vec.at[0, :H1].set(p["b1"].reshape(-1))
    vec = vec.at[1, :H2].set(b2f.reshape(-1))
    vec = vec.at[2, :H2].set(w3f.reshape(-1))
    scal = jnp.stack([b3f, p["lam"].reshape(())]).astype(jnp.float32)   # [b3', lambda]

    fp = dict(w1=p["w1"], w2=w2f, vec=vec, scal=scal)
    if D % 128 != 0:
        # Fallback conv path operands: host-built, loop-invariant, resident.
        idx = jnp.arange(D)
        d = idx[:, None] - idx[None, :]
        fp["s1"] = (jnp.abs(d) == 1).astype(jnp.float32)
        fp["s2"] = (jnp.abs(d) == 2).astype(jnp.float32)
    return fp


def _pick_block_b(B, D, use_roll):
    """Adaptive batch-block size.

    Targets ~2 MiB x/target/out blocks at small D (amortizes the per-grid-step
    overhead at large B), caps so 3 row operands x 2 pipeline buffers plus the
    resident weights stay within a conservative ~24 MiB budget (fits v7x's
    64 MiB VMEM), and forces >= 2 grid steps for B > 256 so the "parallel" axis
    can use both v7x TensorCores.
    """
    row_bytes = D * 4
    target_rows = (2 << 20) // row_bytes
    resident = (D * (D // 2) + (D // 2) * H2) * 4          # w1, w2'
    if not use_roll:
        resident += 2 * D * D * 4                          # s1, s2
    avail = max((24 << 20) - 2 * resident, 1 << 20)        # weights may double-buffer
    cap_rows = avail // (8 * row_bytes)                    # 3 ops x 2 bufs + intermediates
    bb = max(8, min(target_rows, cap_rows, 4096))
    if B > 256:
        bb = min(bb, -(-B // 2))                           # at least 2 grid steps (v7x)
    bb = max(8, (bb // 8) * 8)                             # sublane-aligned block
    return B if bb >= B else bb


def att_variance_smoothing(x, target, fp, *, block_b=None):
    B, D = x.shape
    H1 = fp["w1"].shape[1]
    use_roll = (D % 128 == 0)

    if block_b is None:
        block_b = _pick_block_b(B, D, use_roll)
    grid = (pl.cdiv(B, block_b),)

    row_spec = pl.BlockSpec((block_b, D), lambda i: (i, 0))
    const = lambda i: (0, 0)
    # Resident (constant index_map) operands are fetched once and revisited.
    # (pl.Buffered(1) could shave the second VMEM buffer of w1 at very large D
    #  on v7x; left at the default for portability.)
    in_specs = [
        row_spec,                                           # x        (blocked over B)
        row_spec,                                           # target   (blocked over B)
        pl.BlockSpec((D, H1), const),                       # w1       (resident)
        pl.BlockSpec((H1, H2), const),                      # w2'      (resident)
        pl.BlockSpec(fp["vec"].shape, const),               # packed b1 | b2' | w3'
        pl.BlockSpec(memory_space=pltpu.MemorySpace.SMEM),  # [b3', lambda] scalars
    ]
    args = [x, target, fp["w1"], fp["w2"], fp["vec"], fp["scal"]]
    if not use_roll:
        in_specs += [pl.BlockSpec((D, D), const),           # s1 (resident)
                     pl.BlockSpec((D, D), const)]           # s2 (resident)
        args += [fp["s1"], fp["s2"]]

    return pl.pallas_call(
        _make_kernel(use_roll),
        out_shape=jax.ShapeDtypeStruct((B, D), jnp.float32),
        grid=grid,
        in_specs=in_specs,
        out_specs=row_spec,
        # The blend fully overwrites every output block -> reuse target's buffer.
        input_output_aliases={1: 0},
        compiler_params=pltpu.CompilerParams(
            dimension_semantics=("parallel",),   # both cores on v7x; no-op on v5e/v6e
            vmem_limit_bytes=32 * 1024 * 1024,
        ),
    )(*args)


def reference(x, target, p):
    """Pure-JAX reference mirroring the PyTorch forward (unfolded params)."""
    def ln(h, g, b):
        m = h.mean(-1, keepdims=True)
        v = ((h - m) ** 2).mean(-1, keepdims=True)
        return (h - m) / jnp.sqrt(v + LN_EPS) * g + b

    h = jax.nn.relu(x @ p["w1"] + p["b1"])
    h = ln(h, p["g1"], p["be1"])
    h = jax.nn.relu(h @ p["w2"] + p["b2"])
    h = ln(h, p["g2"], p["be2"])
    sigma = jax.nn.sigmoid(h @ p["w3"] + p["b3"]) + 1e-10
    offs = jnp.arange(-PAD, PAD + 1, dtype=jnp.float32)
    k = jnp.exp(-0.5 * (offs[None, :] / sigma) ** 2)
    k = k / k.sum(-1, keepdims=True)
    D = x.shape[1]
    xp = jnp.pad(x, ((0, 0), (PAD, PAD)))
    y = sum(k[:, t:t + 1] * xp[:, t:t + D] for t in range(KSIZE))
    return target + p["lam"][0, 0] * (y - target)


if __name__ == "__main__":
    key = jax.random.PRNGKey(0)
    # Case 1: D = 32  -> non-lane-aligned, host-precomputed banded-matmul conv path.
    # Case 2: D = 128 -> lane-aligned, pltpu.roll + edge-mask conv path, 3-step grid.
    for (batch, style_dim, block_b) in ((4, 32, None), (24, 128, 8)):
        key, kx, kt, kp = jax.random.split(key, 4)
        x = jax.random.normal(kx, (batch, style_dim), jnp.float32)
        target = jax.random.normal(kt, (batch, style_dim), jnp.float32)
        params = init_params(style_dim, kp)
        folded = fold_params(params)

        ref = reference(x, target, params)   # computed before the (aliased) call
        out = jax.block_until_ready(
            att_variance_smoothing(x, target, folded, block_b=block_b))

        assert out.shape == (batch, style_dim)
        assert jnp.allclose(out, ref, atol=1e-4, rtol=1e-4), \
            f"mismatch vs. reference at D={style_dim}"

    print("KERNEL_OK")
</pallas_src>

<mosaic_0001>
module attributes {stable_mosaic.version = 11 : i64} {
  func.func @kernel(%arg0: i32, %arg1: memref<4x32xf32, #tpu.memory_space<vmem>>, %arg2: memref<4x32xf32, #tpu.memory_space<vmem>>, %arg3: memref<32x16xf32, #tpu.memory_space<vmem>>, %arg4: memref<16x64xf32, #tpu.memory_space<vmem>>, %arg5: memref<3x128xf32, #tpu.memory_space<vmem>>, %arg6: memref<2xf32, #tpu.memory_space<smem>>, %arg7: memref<32x32xf32, #tpu.memory_space<vmem>>, %arg8: memref<32x32xf32, #tpu.memory_space<vmem>>, %arg9: memref<4x32xf32, #tpu.memory_space<vmem>>) attributes {dimension_semantics = [#tpu.dimension_semantics<parallel>], iteration_bounds = array<i64: 1>, scalar_prefetch = 0 : i64, scratch_operands = 0 : i64, tpu.core_type = #tpu.core_type<tc>, window_params = [{transform_indices = @transform_0, window_bounds = array<i64: 4, 32>}, {transform_indices = @transform_1, window_bounds = array<i64: 4, 32>}, {pipeline_mode = #tpu.pipeline_mode<synchronous>, transform_indices = @transform_2, window_bounds = array<i64: 32, 16>}, {pipeline_mode = #tpu.pipeline_mode<synchronous>, transform_indices = @transform_3, window_bounds = array<i64: 16, 64>}, {pipeline_mode = #tpu.pipeline_mode<synchronous>, transform_indices = @transform_4, window_bounds = array<i64: 3, 128>}, {transform_indices = @transform_5, window_bounds = array<i64: 2>}, {pipeline_mode = #tpu.pipeline_mode<synchronous>, transform_indices = @transform_6, window_bounds = array<i64: 32, 32>}, {pipeline_mode = #tpu.pipeline_mode<synchronous>, transform_indices = @transform_7, window_bounds = array<i64: 32, 32>}, {transform_indices = @transform_8, window_bounds = array<i64: 4, 32>}]} {
    %c0 = arith.constant 0 : index
    %c0_0 = arith.constant 0 : index
    %0 = vector.load %arg1[%c0, %c0_0] : memref<4x32xf32, #tpu.memory_space<vmem>>, vector<4x32xf32>
    %c0_1 = arith.constant 0 : index
    %c0_2 = arith.constant 0 : index
    %1 = vector.load %arg5[%c0_1, %c0_2] : memref<3x128xf32, #tpu.memory_space<vmem>>, vector<3x128xf32>
    %2 = vector.extract_strided_slice %1 {offsets = [0, 0], sizes = [1, 16], strides = [1, 1]} : vector<3x128xf32> to vector<1x16xf32>
    %3 = vector.extract_strided_slice %1 {offsets = [1, 0], sizes = [1, 64], strides = [1, 1]} : vector<3x128xf32> to vector<1x64xf32>
    %4 = vector.extract_strided_slice %1 {offsets = [2, 0], sizes = [1, 64], strides = [1, 1]} : vector<3x128xf32> to vector<1x64xf32>
    %c0_3 = arith.constant 0 : index
    %5 = memref.load %arg6[%c0_3] : memref<2xf32, #tpu.memory_space<smem>>
    %c1 = arith.constant 1 : index
    %6 = memref.load %arg6[%c1] : memref<2xf32, #tpu.memory_space<smem>>
    %c0_4 = arith.constant 0 : index
    %c0_5 = arith.constant 0 : index
    %7 = vector.load %arg3[%c0_4, %c0_5] : memref<32x16xf32, #tpu.memory_space<vmem>>, vector<32x16xf32>
    %cst = arith.constant dense<0.000000e+00> : vector<4x16xf32>
    %8 = tpu.matmul %0, %7, %cst {dimension_numbers = #tpu.dot_dimension_numbers<[1], [0], [0], [1], [0, 0, 1, 1], [], []>} : vector<4x32xf32>, vector<32x16xf32>, vector<4x16xf32> -> vector<4x16xf32>
    %9 = vector.broadcast %2 : vector<1x16xf32> to vector<4x16xf32>
    %10 = arith.addf %8, %9 : vector<4x16xf32>
    %cst_6 = arith.constant 0.000000e+00 : f32
    %11 = vector.broadcast %cst_6 : f32 to vector<4x16xf32>
    %12 = arith.maximumf %10, %11 : vector<4x16xf32>
    %cst_7 = arith.constant dense<0.000000e+00> : vector<4xf32>
    %13 = vector.multi_reduction <add>, %12, %cst_7 [1] : vector<4x16xf32> to vector<4xf32>
    %14 = vector.shape_cast %13 : vector<4xf32> to vector<4x1xf32>
    %cst_8 = arith.constant 6.250000e-02 : f32
    %15 = vector.broadcast %cst_8 : f32 to vector<4x1xf32>
    %16 = arith.mulf %14, %15 : vector<4x1xf32>
    %17 = vector.broadcast %16 : vector<4x1xf32> to vector<4x16xf32>
    %18 = arith.subf %12, %17 : vector<4x16xf32>
    %19 = arith.mulf %18, %18 : vector<4x16xf32>
    %cst_9 = arith.constant dense<0.000000e+00> : vector<4xf32>
    %20 = vector.multi_reduction <add>, %19, %cst_9 [1] : vector<4x16xf32> to vector<4xf32>
    %21 = vector.shape_cast %20 : vector<4xf32> to vector<4x1xf32>
    %cst_10 = arith.constant 6.250000e-02 : f32
    %22 = vector.broadcast %cst_10 : f32 to vector<4x1xf32>
    %23 = arith.mulf %21, %22 : vector<4x1xf32>
    %cst_11 = arith.constant 9.99999974E-6 : f32
    %24 = vector.broadcast %cst_11 : f32 to vector<4x1xf32>
    %25 = arith.addf %23, %24 : vector<4x1xf32>
    %26 = math.rsqrt %25 : vector<4x1xf32>
    %27 = vector.broadcast %26 : vector<4x1xf32> to vector<4x16xf32>
    %28 = arith.mulf %18, %27 : vector<4x16xf32>
    %c0_12 = arith.constant 0 : index
    %c0_13 = arith.constant 0 : index
    %29 = vector.load %arg4[%c0_12, %c0_13] : memref<16x64xf32, #tpu.memory_space<vmem>>, vector<16x64xf32>
    %cst_14 = arith.constant dense<0.000000e+00> : vector<4x64xf32>
    %30 = tpu.matmul %28, %29, %cst_14 {dimension_numbers = #tpu.dot_dimension_numbers<[1], [0], [0], [1], [0, 0, 1, 1], [], []>} : vector<4x16xf32>, vector<16x64xf32>, vector<4x64xf32> -> vector<4x64xf32>
    %31 = vector.broadcast %3 : vector<1x64xf32> to vector<4x64xf32>
    %32 = arith.addf %30, %31 : vector<4x64xf32>
    %cst_15 = arith.constant 0.000000e+00 : f32
    %33 = vector.broadcast %cst_15 : f32 to vector<4x64xf32>
    %34 = arith.maximumf %32, %33 : vector<4x64xf32>
    %cst_16 = arith.constant dense<0.000000e+00> : vector<4xf32>
    %35 = vector.multi_reduction <add>, %34, %cst_16 [1] : vector<4x64xf32> to vector<4xf32>
    %36 = vector.shape_cast %35 : vector<4xf32> to vector<4x1xf32>
    %cst_17 = arith.constant 1.562500e-02 : f32
    %37 = vector.broadcast %cst_17 : f32 to vector<4x1xf32>
    %38 = arith.mulf %36, %37 : vector<4x1xf32>
    %39 = vector.broadcast %38 : vector<4x1xf32> to vector<4x64xf32>
    %40 = arith.subf %34, %39 : vector<4x64xf32>
    %41 = arith.mulf %40, %40 : vector<4x64xf32>
    %cst_18 = arith.constant dense<0.000000e+00> : vector<4xf32>
    %42 = vector.multi_reduction <add>, %41, %cst_18 [1] : vector<4x64xf32> to vector<4xf32>
    %43 = vector.shape_cast %42 : vector<4xf32> to vector<4x1xf32>
    %cst_19 = arith.constant 1.562500e-02 : f32
    %44 = vector.broadcast %cst_19 : f32 to vector<4x1xf32>
    %45 = arith.mulf %43, %44 : vector<4x1xf32>
    %cst_20 = arith.constant 9.99999974E-6 : f32
    %46 = vector.broadcast %cst_20 : f32 to vector<4x1xf32>
    %47 = arith.addf %45, %46 : vector<4x1xf32>
    %48 = math.rsqrt %47 : vector<4x1xf32>
    %49 = vector.broadcast %48 : vector<4x1xf32> to vector<4x64xf32>
    %50 = arith.mulf %40, %49 : vector<4x64xf32>
    %51 = vector.broadcast %4 : vector<1x64xf32> to vector<4x64xf32>
    %52 = arith.mulf %50, %51 : vector<4x64xf32>
    %cst_21 = arith.constant dense<0.000000e+00> : vector<4xf32>
    %53 = vector.multi_reduction <add>, %52, %cst_21 [1] : vector<4x64xf32> to vector<4xf32>
    %54 = vector.shape_cast %53 : vector<4xf32> to vector<4x1xf32>
    %55 = vector.broadcast %5 : f32 to vector<4x1xf32>
    %56 = arith.addf %54, %55 : vector<4x1xf32>
    %57 = arith.negf %56 : vector<4x1xf32>
    %58 = math.exp %57 : vector<4x1xf32>
    %cst_22 = arith.constant 1.000000e+00 : f32
    %59 = vector.broadcast %cst_22 : f32 to vector<4x1xf32>
    %60 = arith.addf %59, %58 : vector<4x1xf32>
    %61 = arith.divf %59, %60 : vector<4x1xf32>
    %cst_23 = arith.constant 1.000000e-10 : f32
    %62 = vector.broadcast %cst_23 : f32 to vector<4x1xf32>
    %63 = arith.addf %61, %62 : vector<4x1xf32>
    %64 = arith.mulf %63, %63 : vector<4x1xf32>
    %cst_24 = arith.constant 1.000000e+00 : f32
    %65 = vector.broadcast %cst_24 : f32 to vector<4x1xf32>
    %66 = arith.divf %65, %64 : vector<4x1xf32>
    %cst_25 = arith.constant -5.000000e-01 : f32
    %67 = vector.broadcast %cst_25 : f32 to vector<4x1xf32>
    %68 = arith.mulf %67, %66 : vector<4x1xf32>
    %69 = math.exp %68 : vector<4x1xf32>
    %cst_26 = arith.constant -2.000000e+00 : f32
    %70 = vector.broadcast %cst_26 : f32 to vector<4x1xf32>
    %71 = arith.mulf %70, %66 : vector<4x1xf32>
    %72 = math.exp %71 : vector<4x1xf32>
    %73 = arith.addf %69, %72 : vector<4x1xf32>
    %cst_27 = arith.constant 2.000000e+00 : f32
    %74 = vector.broadcast %cst_27 : f32 to vector<4x1xf32>
    %75 = arith.mulf %74, %73 : vector<4x1xf32>
    %cst_28 = arith.constant 1.000000e+00 : f32
    %76 = vector.broadcast %cst_28 : f32 to vector<4x1xf32>
    %77 = arith.addf %76, %75 : vector<4x1xf32>
    %cst_29 = arith.constant 1.000000e+00 : f32
    %78 = vector.broadcast %cst_29 : f32 to vector<4x1xf32>
    %79 = arith.divf %78, %77 : vector<4x1xf32>
    %80 = arith.mulf %69, %79 : vector<4x1xf32>
    %81 = arith.mulf %72, %79 : vector<4x1xf32>
    %c0_30 = arith.constant 0 : index
    %c0_31 = arith.constant 0 : index
    %82 = vector.load %arg7[%c0_30, %c0_31] : memref<32x32xf32, #tpu.memory_space<vmem>>, vector<32x32xf32>
    %cst_32 = arith.constant dense<0.000000e+00> : vector<4x32xf32>
    %83 = tpu.matmul %0, %82, %cst_32 {dimension_numbers = #tpu.dot_dimension_numbers<[1], [0], [0], [1], [0, 0, 1, 1], [], []>} : vector<4x32xf32>, vector<32x32xf32>, vector<4x32xf32> -> vector<4x32xf32>
    %c0_33 = arith.constant 0 : index
    %c0_34 = arith.constant 0 : index
    %84 = vector.load %arg8[%c0_33, %c0_34] : memref<32x32xf32, #tpu.memory_space<vmem>>, vector<32x32xf32>
    %cst_35 = arith.constant dense<0.000000e+00> : vector<4x32xf32>
    %85 = tpu.matmul %0, %84, %cst_35 {dimension_numbers = #tpu.dot_dimension_numbers<[1], [0], [0], [1], [0, 0, 1, 1], [], []>} : vector<4x32xf32>, vector<32x32xf32>, vector<4x32xf32> -> vector<4x32xf32>
    %86 = vector.broadcast %79 : vector<4x1xf32> to vector<4x32xf32>
    %87 = arith.mulf %86, %0 : vector<4x32xf32>
    %88 = vector.broadcast %80 : vector<4x1xf32> to vector<4x32xf32>
    %89 = arith.mulf %88, %83 : vector<4x32xf32>
    %90 = arith.addf %87, %89 : vector<4x32xf32>
    %91 = vector.broadcast %81 : vector<4x1xf32> to vector<4x32xf32>
    %92 = arith.mulf %91, %85 : vector<4x32xf32>
    %93 = arith.addf %90, %92 : vector<4x32xf32>
    %c0_36 = arith.constant 0 : index
    %c0_37 = arith.constant 0 : index
    %94 = vector.load %arg2[%c0_36, %c0_37] : memref<4x32xf32, #tpu.memory_space<vmem>>, vector<4x32xf32>
    %95 = arith.subf %93, %94 : vector<4x32xf32>
    %96 = vector.broadcast %6 : f32 to vector<4x32xf32>
    %97 = arith.mulf %96, %95 : vector<4x32xf32>
    %98 = arith.addf %94, %97 : vector<4x32xf32>
    %c0_38 = arith.constant 0 : index
    %c0_39 = arith.constant 0 : index
    %99 = vector.load %arg9[%c0_38, %c0_39] : memref<4x32xf32, #tpu.memory_space<vmem>>, vector<4x32xf32>
    tpu.vector_store %arg9[%c0_38, %c0_39], %98 {strides = array<i32>} : memref<4x32xf32, #tpu.memory_space<vmem>>, vector<4x32xf32>,
    return
  }
  func.func @transform_0(%arg0: i32) -> (i32, i32) {
    %c0_i32 = arith.constant 0 : i32
    %c0_i32_0 = arith.constant 0 : i32
    return %arg0, %c0_i32 : i32, i32
  }
  func.func @transform_1(%arg0: i32) -> (i32, i32) {
    %c0_i32 = arith.constant 0 : i32
    %c0_i32_0 = arith.constant 0 : i32
    return %arg0, %c0_i32 : i32, i32
  }
  func.func @transform_2(%arg0: i32) -> (i32, i32) {
    %c0_i32 = arith.constant 0 : i32
    %c0_i32_0 = arith.constant 0 : i32
    %c0_i32_1 = arith.constant 0 : i32
    return %c0_i32, %c0_i32_0 : i32, i32
  }
  func.func @transform_3(%arg0: i32) -> (i32, i32) {
    %c0_i32 = arith.constant 0 : i32
    %c0_i32_0 = arith.constant 0 : i32
    %c0_i32_1 = arith.constant 0 : i32
    return %c0_i32, %c0_i32_0 : i32, i32
  }
  func.func @transform_4(%arg0: i32) -> (i32, i32) {
    %c0_i32 = arith.constant 0 : i32
    %c0_i32_0 = arith.constant 0 : i32
    %c0_i32_1 = arith.constant 0 : i32
    return %c0_i32, %c0_i32_0 : i32, i32
  }
  func.func @transform_5(%arg0: i32) -> i32 {
    %c0_i32 = arith.constant 0 : i32
    %c0_i32_0 = arith.constant 0 : i32
    return %c0_i32 : i32
  }
  func.func @transform_6(%arg0: i32) -> (i32, i32) {
    %c0_i32 = arith.constant 0 : i32
    %c0_i32_0 = arith.constant 0 : i32
    %c0_i32_1 = arith.constant 0 : i32
    return %c0_i32, %c0_i32_0 : i32, i32
  }
  func.func @transform_7(%arg0: i32) -> (i32, i32) {
    %c0_i32 = arith.constant 0 : i32
    %c0_i32_0 = arith.constant 0 : i32
    %c0_i32_1 = arith.constant 0 : i32
    return %c0_i32, %c0_i32_0 : i32, i32
  }
  func.func @transform_8(%arg0: i32) -> (i32, i32) {
    %c0_i32 = arith.constant 0 : i32
    %c0_i32_0 = arith.constant 0 : i32
    return %arg0, %c0_i32 : i32, i32
  }
}

</mosaic_0001>

<bundles_post_ra>
// kernel: tpu_custom_call.1
= control target key start
LH: loop header
LB: loop body
LE: loop exit
PB: predicated region body
PF: predicated region fallthrough
CT: control target
= control target key end

     0   :  { %13 = vsyncpa [#allocation3], 0  ;;  %s565_s0 = inlined_call_operand.vmem [shape: f32[4,32], index: 0, kind: input, shape index: {}]   ;;  %s566_s1 = inlined_call_operand.hbm [shape: f32[4,32], index: 1, kind: input, shape index: {}, may-alias: {1,8}]   ;;  %s567_s2 = inlined_call_operand.vmem [shape: f32[32,16], index: 2, kind: input, shape index: {}]   ;;  %s568_s3 = inlined_call_operand.vmem [shape: f32[16,64], index: 3, kind: input, shape index: {}]   ;;  %s569_s4 = inlined_call_operand.vmem [shape: f32[3,128], index: 4, kind: input, shape index: {}]   ;;  %s570_s5 = inlined_call_operand.vmem [shape: f32[2], index: 5, kind: input, shape index: {}]   ;;  %s571_s6 = inlined_call_operand.vmem [shape: f32[32,32], index: 6, kind: input, shape index: {}]   ;;  %s572_s7 = inlined_call_operand.hbm [shape: f32[32,32], index: 7, kind: input, shape index: {}]   ;;  %s573_s8 = inlined_call_operand.hbm [shape: f32[4,32], index: 8, kind: output, shape index: {}, may-alias: {1,8}]  }
   0x1   :  { %14 = vsyncpa [#allocation5], 0 }
   0x2   :  { %15 = vsyncpa [#allocation8], 0 }
   0x3   :  { %16 = vsyncpa [#allocation4], 0  ;;  %s24_s29 = sshll.u32 %s566_s1, 4  ;;  %s449_s30 = smov [#allocation2]   ;;  %s25_s29 = int_to_ptr.hbm [resolvable:$true] %s24_s29 }
   0x4   :  { %s26_s9 = sshll.u32 %s449_s30, 4  ;;  %s41_s12 = sshll.u32 %s570_s5, 4  ;;  %s27_s9 = int_to_ptr.vmem [resolvable:$true] %s26_s9  ;;  %s42_s12 = int_to_ptr.vmem [resolvable:$true] %s41_s12 }
   0x5   :  { %29 = dma.hbm_to_vmem [thread:$0]  %s25_s29, 64, %s27_s9, [#allocation3]  }
   0x6   :  { %s450_s13 = smov [#allocation6]   ;;  %s51_s16 = sshll.u32 %s572_s7, 4  ;;  %s52_s16 = int_to_ptr.hbm [resolvable:$true] %s51_s16 }
   0x7   :  { %44 = dma.vmem_to_smem %s42_s12, 16, %s450_s13, [#allocation5]  }
   0x8   :  { %s451_s17 = smov [#allocation7]   ;;  %s452_s1 = smov 128  }
   0x9   :  { %s53_s18 = sshll.u32 %s451_s17, 4  ;;  %s453_s19 = smov 8   ;;  %s54_s18 = int_to_ptr.vmem [resolvable:$true] %s53_s18 }
   0xa   :  { %59 = dma.hbm_to_vmem [thread:$0]  %s52_s16, 512, %s54_s18, [#allocation8], %s452_s1, %s452_s1, %s453_s19  }
   0xb   :  { %441 = dma.done.wait [#allocation3], 64  }
   0xc   :  { %442 = vsyncadd [#allocation3], 4294967232 }
   0xd   :  { %443 = dma.done.wait [#allocation5], 16  }
   0xe   :  { %444 = vsyncadd [#allocation5], 4294967280 }
   0xf   :  { %445 = dma.done.wait [#allocation8], 512  }
  0x10   :  { %446 = vsyncadd [#allocation8], 4294966784 }
  0x11   :  { %72 = sfence }
  0x12   :  { %v80_v0 = vld [vmem:[%s567_s2 + $0x18] sm:$0xff]  ;;  %v79_v1 = vld [vmem:[%s567_s2 + $0x10] sm:$0xff]  ;;  %v78_v2 = vld [vmem:[%s567_s2 + $0x8] sm:$0xff]  ;;  %vm82_vm0 = vcmask 261120   ;;  %vm107_vm1 = vcmask 125952   ;;  %vm133_vm5 = vcmask 130048  }
  0x13   :  { %98 = vmatpush.msra.mxu0 %v80_v0  ;;  %v77_v3 = vld [vmem:[%s567_s2] sm:$0xff]  ;;  %v131_v16 = vld [vmem:[%s568_s3 + $0x8] sm:$0xff]  ;;  %vm158_vm6 = vcmask 519168   ;;  %v253_v39 = vld [vmem:[%s571_s6 + $0x18] sm:$0xff]  ;;  %s329_s16 = sld [smem:[#allocation6 + $0x1]]  ;;  %s454_s17 = smov [#allocation9]  }
  0x14   :  { %v524_v4 = vld [vmem:[%s565_s0] sm:$0xf]  ;;  %151 = vmatpush.msra.mxu1 %v131_v16  ;;  %v252_v41 = vld [vmem:[%s571_s6 + $0x10] sm:$0xff]  ;;  %266 = vmatpush.msra.mxu2 %v253_v39  ;;  %v251_v43 = vld [vmem:[%s571_s6 + $0x8] sm:$0xff]  ;;  %s315_s18 = sshll.u32 %s454_s17, 4  ;;  %s317_s5 = sshll.u32 %s573_s8, 4  ;;  %s316_s18 = int_to_ptr.vmem [resolvable:$true] %s315_s18  ;;  %s318_s5 = int_to_ptr.hbm [resolvable:$true] %s317_s5 }
  0x15   :  { %99 = vmatpush.msra.mxu0 %v79_v1  ;;  %v531_v5 = vld [vmem:[%s569_s4] sm:$0x7]  ;;  %v276_v42 = vld [vmem:[#allocation7 + $0x10] sm:$0xff]  ;;  %v275_v44 = vld [vmem:[#allocation7 + $0x8] sm:$0xff] }
  0x16   :  { %v81_v6 = vperm.slane %v531_v5, 0  ;;  %v130_v17 = vld [vmem:[%s568_s3] sm:$0xff]  ;;  %v132_v29 = vperm.slane %v531_v5, 1  ;;  %267 = vmatpush.msra.mxu2 %v252_v41  ;;  %v181_v56 = vperm.slane %v531_v5, 2 }
  0x17   :  { %100 = vmatpush.msra.mxu0 %v78_v2  ;;  %152 = vmatpush.msra.mxu1 %v130_v17  ;;  %v277_v40 = vld [vmem:[#allocation7 + $0x18] sm:$0xff]  ;;  %v274_v47 = vld [vmem:[#allocation7] sm:$0xff] }
  0x18   :  { %290 = vmatpush.msra.mxu3 %v277_v40  ;;  %v250_v46 = vld [vmem:[%s571_s6] sm:$0xff]  ;;  %268 = vmatpush.msra.mxu2 %v251_v43  ;;  %s75_s6 = sld [smem:[#allocation6]] }
  0x19   :  { %101 = vmatpush.msra.mxu0 %v77_v3 }
  0x1a   :  { %330 = vmatmul.msk.f32.vlgmr.msra.gmra.mxu0 %vm82_vm0, %v524_v4  ;;  %291 = vmatpush.msra.mxu3 %v276_v42 }
  0x1b   :  { %269 = vmatpush.msra.mxu2 %v250_v46 }
  0x1c   :  { %292 = vmatpush.msra.mxu3 %v275_v44  ;;  %333 = vmatmul.msk.f32.vlgmr.msra.gmra.mxu2 %vm82_vm0, %v524_v4 }
  0x1e   :  { %293 = vmatpush.msra.mxu3 %v274_v47  ;;  %v186_v61 = vstv %s75_s6 }
  0x1f   :  { %334 = vmatmul.msk.f32.vlgmr.msra.gmra.mxu3 %vm82_vm0, %v524_v4 }
  0x97   :  { %v103_v7 = vpop.f32.mrf.mxu0 }
  0x98   :  { %v104_v8 = vadd.f32 %v103_v7, %v81_v6 }
  0x9a   :  { %v106_v9 = vmax.f32 %v104_v8, 0.0 }
  0x9c   :  { %v108_v10 = vsel %vm107_vm1, %v106_v9, 0.0 }
  0x9d   :  { %109 = vadd.xlane.f32.xlu0 %v108_v10 }
 0x110   :  { %v110_v11 = vpop.xlane.xlu0 %109 }
 0x111   :  { %v111_v12 = vmul.f32 0.0625, %v110_v11 }
 0x113   :  { %v112_v13 = vsub.f32 %v106_v9, %v111_v12 }
 0x115   :  { %v113_v14 = vmul.f32 %v112_v13, %v112_v13 }
 0x117   :  { %v114_v15 = vsel %vm107_vm1, %v113_v14, 0.0 }
 0x118   :  { %115 = vadd.xlane.f32.xlu0 %v114_v15 }
 0x18b   :  { %v116_v18 = vpop.xlane.xlu0 %115 }
 0x18c   :  { %v117_v19 = vmul.f32 0.0625, %v116_v18 }
 0x18e   :  { %v118_v20 = vadd.f32 1e-05, %v117_v19 }
 0x190   :  { %341 = vrsqrt.f32 %v118_v20  ;;  %vm125_vm3 = vweird.f32 %v118_v20 }
 0x196   :  { %v342_v21 = vpop.eup %341 }
 0x197   :  { %v120_v22 = vmul.f32 %v342_v21, %v118_v20  ;;  %vm126_vm2 = vweird.f32 %v342_v21 }
 0x198   :  { %vm127_vm4 = vmor %vm125_vm3, %vm126_vm2 }
 0x199   :  { %v121_v23 = vmul.f32 %v342_v21, %v120_v22 }
 0x19b   :  { %v122_v24 = vmul.f32 0.5, %v121_v23 }
 0x19d   :  { %v123_v25 = vsub.f32 1.5, %v122_v24 }
 0x19f   :  { %v124_v26 = vmul.f32 %v342_v21, %v123_v25 }
 0x1a1   :  { %v128_v27 = vsel %vm127_vm4, %v342_v21, %v124_v26 }
 0x1a2   :  { %v129_v28 = vmul.f32 %v128_v27, %v112_v13 }
 0x1a4   :  { %331 = vmatmul.msk.f32.vlgmr.msra.gmra.mxu1 %vm133_vm5, %v129_v28 }
 0x221   :  { %v154_v30 = vpop.f32.mrf.mxu1 }
 0x222   :  { %v155_v31 = vadd.f32 %v154_v30, %v132_v29 }
 0x224   :  { %v157_v32 = vmax.f32 %v155_v31, 0.0 }
 0x226   :  { %v159_v33 = vsel %vm158_vm6, %v157_v32, 0.0 }
 0x227   :  { %160 = vadd.xlane.f32.xlu1 %v159_v33 }
 0x29a   :  { %v161_v34 = vpop.xlane.xlu1 %160 }
 0x29b   :  { %v162_v35 = vmul.f32 0.015625, %v161_v34 }
 0x29d   :  { %v163_v36 = vsub.f32 %v157_v32, %v162_v35 }
 0x29f   :  { %v164_v37 = vmul.f32 %v163_v36, %v163_v36 }
 0x2a1   :  { %v165_v38 = vsel %vm158_vm6, %v164_v37, 0.0 }
 0x2a2   :  { %166 = vadd.xlane.f32.xlu1 %v165_v38 }
 0x315   :  { %v167_v45 = vpop.xlane.xlu1 %166 }
 0x316   :  { %v168_v48 = vmul.f32 0.015625, %v167_v45  ;;  %v271_v45 = vpop.f32.mrf.mxu2 }
 0x318   :  { %v169_v49 = vadd.f32 1e-05, %v168_v48  ;;  %v295_v48 = vpop.f32.mrf.mxu3 }
 0x31a   :  { %343 = vrsqrt.f32 %v169_v49  ;;  %vm176_vm8 = vweird.f32 %v169_v49 }
 0x320   :  { %v344_v50 = vpop.eup %343 }
 0x321   :  { %v171_v51 = vmul.f32 %v344_v50, %v169_v49  ;;  %vm177_vm7 = vweird.f32 %v344_v50 }
 0x322   :  { %vm178_vm9 = vmor %vm176_vm8, %vm177_vm7 }
 0x323   :  { %v172_v52 = vmul.f32 %v344_v50, %v171_v51 }
 0x325   :  { %v173_v53 = vmul.f32 0.5, %v172_v52 }
 0x327   :  { %v174_v54 = vsub.f32 1.5, %v173_v53  ;;  %v303_v53 = vld [vmem:[#allocation2] sm:$0xf] }
 0x329   :  { %v175_v55 = vmul.f32 %v344_v50, %v174_v54 }
 0x32b   :  { %v179_v57 = vsel %vm178_vm9, %v344_v50, %v175_v55  ;;  %v305_v55 = vstv %s329_s16 }
 0x32c   :  { %v180_v58 = vmul.f32 %v179_v57, %v163_v36 }
 0x32e   :  { %v182_v59 = vmul.f32 %v181_v56, %v180_v58 }
 0x330   :  { %v183_v60 = vsel %vm158_vm6, %v182_v59, 0.0  ;;  %vm308_vm6 = vcmask 257024  }
 0x331   :  { %184 = vadd.xlane.f32.xlu2 %v183_v60 }
 0x3a4   :  { %v185_v62 = vpop.xlane.xlu2 %184 }
 0x3a5   :  { %v187_v63 = vadd.f32 %v186_v61, %v185_v62 }
 0x3a7   :  { %v332_v0 = vmul.f32 -1.442695, %v187_v63 }
 0x3a9   :  { %345 = vpow2.f32 %v332_v0 }
 0x3af   :  { %v346_v1 = vpop.eup %345 }
 0x3b0   :  { %v191_v2 = vadd.f32 1.0, %v346_v1 }
 0x3b2   :  { %347 = vrcp.f32 %v191_v2  ;;  %v203_v8 = vand.u32 2147483648, %v191_v2  ;;  %v201_v9 = vand.u32 2147483647, %v191_v2  ;;  %vm197_vm11 = vweird.f32 %v191_v2 }
 0x3b4   :  { %v204_v11 = vor.u32 1.1754944e-38, %v203_v8  ;;  %vm202_vm13 = vcmp.eq.f32.partialorder %v201_v9, 8.507059e+37 }
 0x3b8   :  { %v348_v3 = vpop.eup %347 }
 0x3b9   :  { %v193_v6 = vmul.f32 %v348_v3, %v191_v2  ;;  %vm198_vm10 = vweird.f32 %v348_v3 }
 0x3ba   :  { %vm199_vm12 = vmor %vm197_vm11, %vm198_vm10 }
 0x3bb   :  { %v194_v7 = vsub.f32 1.0, %v193_v6 }
 0x3bd   :  { %v195_v5 = vmul.f32 %v348_v3, %v194_v7 }
 0x3bf   :  { %v196_v10 = vadd.f32 %v348_v3, %v195_v5 }
 0x3c1   :  { %v200_v12 = vsel %vm199_vm12, %v348_v3, %v196_v10 }
 0x3c2   :  { %v205_v13 = vsel %vm202_vm13, %v204_v11, %v200_v12 }
 0x3c3   :  { %v207_v14 = vadd.f32 1e-10, %v205_v13 }
 0x3c5   :  { %v208_v15 = vmul.f32 %v207_v14, %v207_v14 }
 0x3c7   :  { %349 = vrcp.f32 %v208_v15  ;;  %v220_v19 = vand.u32 2147483648, %v208_v15  ;;  %v218_v21 = vand.u32 2147483647, %v208_v15  ;;  %vm214_vm15 = vweird.f32 %v208_v15 }
 0x3c9   :  { %v221_v23 = vor.u32 1.1754944e-38, %v220_v19  ;;  %vm219_vm1 = vcmp.eq.f32.partialorder %v218_v21, 8.507059e+37 }
 0x3cd   :  { %v350_v16 = vpop.eup %349 }
 0x3ce   :  { %v210_v17 = vmul.f32 %v350_v16, %v208_v15  ;;  %vm215_vm14 = vweird.f32 %v350_v16 }
 0x3cf   :  { %vm216_vm0 = vmor %vm214_vm15, %vm215_vm14 }
 0x3d0   :  { %v211_v18 = vsub.f32 1.0, %v210_v17 }
 0x3d2   :  { %v212_v20 = vmul.f32 %v350_v16, %v211_v18 }
 0x3d4   :  { %v213_v22 = vadd.f32 %v350_v16, %v212_v20 }
 0x3d6   :  { %v217_v24 = vsel %vm216_vm0, %v350_v16, %v213_v22 }
 0x3d7   :  { %v222_v25 = vsel %vm219_vm1, %v221_v23, %v217_v24 }
 0x3d8   :  { %v224_v26 = vmul.f32 -0.5, %v222_v25  ;;  %v227_v27 = vmul.f32 -2.0, %v222_v25 }
 0x3da   :  { %v225_v28 = vmul.f32 1.442695, %v224_v26  ;;  %v228_v29 = vmul.f32 1.442695, %v227_v27 }
 0x3dc   :  { %351 = vpow2.f32 %v225_v28 }
 0x3dd   :  { %353 = vpow2.f32 %v228_v29 }
 0x3e2   :  { %v352_v30 = vpop.eup %351 }
 0x3e3   :  { %v354_v31 = vpop.eup %353 }
 0x3e4   :  { %v230_v32 = vadd.f32 %v354_v31, %v352_v30 }
 0x3e6   :  { %v231_v33 = vmul.f32 2.0, %v230_v32 }
 0x3e8   :  { %v232_v34 = vadd.f32 1.0, %v231_v33 }
 0x3ea   :  { %355 = vrcp.f32 %v232_v34  ;;  %v244_v38 = vand.u32 2147483648, %v232_v34  ;;  %v242_v40 = vand.u32 2147483647, %v232_v34  ;;  %vm238_vm3 = vweird.f32 %v232_v34 }
 0x3ec   :  { %v245_v42 = vor.u32 1.1754944e-38, %v244_v38  ;;  %vm243_vm5 = vcmp.eq.f32.partialorder %v242_v40, 8.507059e+37 }
 0x3f0   :  { %v356_v35 = vpop.eup %355 }
 0x3f1   :  { %v234_v36 = vmul.f32 %v356_v35, %v232_v34  ;;  %vm239_vm2 = vweird.f32 %v356_v35 }
 0x3f2   :  { %vm240_vm4 = vmor %vm238_vm3, %vm239_vm2 }
 0x3f3   :  { %v235_v37 = vsub.f32 1.0, %v234_v36 }
 0x3f5   :  { %v236_v39 = vmul.f32 %v356_v35, %v235_v37 }
 0x3f7   :  { %v237_v41 = vadd.f32 %v356_v35, %v236_v39 }
 0x3f9   :  { %v241_v43 = vsel %vm240_vm4, %v356_v35, %v237_v41 }
 0x3fa   :  { %v246_v44 = vsel %vm243_vm5, %v245_v42, %v241_v43 }
 0x3fb   :  { %v248_v46 = vmul.f32 %v352_v30, %v246_v44  ;;  %v249_v47 = vmul.f32 %v354_v31, %v246_v44  ;;  %v298_v49 = vmul.f32 %v246_v44, %v524_v4 }
 0x3fd   :  { %v299_v50 = vmul.f32 %v271_v45, %v248_v46  ;;  %v301_v52 = vmul.f32 %v295_v48, %v249_v47 }
 0x3ff   :  { %v300_v51 = vadd.f32 %v299_v50, %v298_v49 }
 0x401   :  { %v302_v54 = vadd.f32 %v301_v52, %v300_v51 }
 0x403   :  { %v304_v56 = vsub.f32 %v302_v54, %v303_v53 }
 0x405   :  { %v306_v57 = vmul.f32 %v305_v55, %v304_v56 }
 0x407   :  { %v307_v58 = vadd.f32 %v306_v57, %v303_v53 }
 0x409   :  { %309 = vst.msk [vmem:[#allocation9] sm:$0xf] %vm308_vm6, %v307_v58 }
 0x40a   :  { %320 = dma.vmem_to_hbm [thread:$0]  %s316_s18, 64, %s318_s5, [#allocation4]  }
 0x40b   :  { %447 = dma.done.wait [#allocation4], 64  }
 0x40c   :  { %448 = vsyncadd [#allocation4], 4294967232 }
 0x40d   :  { %325 = vsyncpa [#allocation3], 1 }
 0x40e   :  { %326 = vsyncpa [#allocation8], 1 }
 0x40f   :  { %327 = vsyncpa [#allocation4], 1 }
 0x410   :  { %328 = vsyncpa [#allocation5], 1 }

</bundles_post_ra>
